<compile_context>
chip_gen: v7x
topology: tpu7x:2x2x1
jax: 0.10.0
libtpu: 0.0.40
codegen_flags: <defaults>
</compile_context>

<pallas_src>
import functools

import jax
import jax.numpy as jnp
from jax.experimental import pallas as pl
from jax.experimental.pallas import tpu as pltpu

LOG_STD_MIN = -20.0
LOG_STD_MAX = 2.0
LANE = 128


def _round_up(x, m):
    return ((x + m - 1) // m) * m


def _pad2(a, rows, cols):
    return jnp.pad(a, ((0, rows - a.shape[0]), (0, cols - a.shape[1])))


# ----------------------------------------------------------------------------- kernel
def actor_kernel(s_ref, w1_ref, b1_ref, w2_ref, b2_ref, wh_ref, bh_ref,
                 out_ref, *, std_off):
    x = s_ref[...]                                           # (tb, n_in) f32, natural width

    # hidden layer 1: bf16 operands on the MXU, f32 accumulation, f32 ReLU (VPU)
    h1 = jnp.dot(x.astype(jnp.bfloat16), w1_ref[...],
                 preferred_element_type=jnp.float32) + b1_ref[...]
    h1 = jnp.maximum(h1, 0.0)

    # hidden layer 2
    h2 = jnp.dot(h1.astype(jnp.bfloat16), w2_ref[...],
                 preferred_element_type=jnp.float32) + b2_ref[...]
    h2 = jnp.maximum(h2, 0.0)

    # fused heads packed into a single 128-lane block:
    #   lanes [0, std_off)            -> mean
    #   lanes [std_off, std_off+n_a)  -> log_std
    head = jnp.dot(h2.astype(jnp.bfloat16), wh_ref[...],
                   preferred_element_type=jnp.float32) + bh_ref[...]

    # clip BEFORE exp so exp is bounded (<= e^2) even on the masked mean lanes,
    # then select std only on the std lanes.  Single lane-dense unmasked store.
    lane = jax.lax.broadcasted_iota(jnp.int32, head.shape, 1)
    std = jnp.exp(jnp.clip(head, LOG_STD_MIN, LOG_STD_MAX))
    out_ref[...] = jnp.where(lane >= std_off, std, head).astype(out_ref.dtype)


# ----------------------------------------------------------------------------- wrapper
@functools.partial(jax.jit, static_argnames=("n_actions", "std_off", "tile_b"))
def actor_forward(state, w1, b1, w2, b2, wh, bh, *, n_actions, std_off, tile_b=1024):
    """state: (batch, n_inputs) f32.  Padded/fused params from prepare_params()."""
    batch, n_in = state.shape
    head_w = wh.shape[1]

    # pad batch only to the 8-row sublane tile, never to the batch tile
    b_pad = _round_up(batch, 8)
    x = state.astype(jnp.float32)
    if b_pad != batch:
        x = jnp.pad(x, ((0, b_pad - batch), (0, 0)))

    # adaptive batch tile: >= 2 grid steps whenever the batch allows it (v7x has two
    # TensorCores on the "parallel" axis), capped at tile_b for v5e's scoped VMEM.
    if b_pad <= 8:
        tb = b_pad
    else:
        tb = max(8, min(tile_b, _round_up(pl.cdiv(b_pad, 2), 8)))
    grid_b = pl.cdiv(b_pad, tb)

    const = lambda i: (0, 0)          # weights / biases: VMEM-resident across grid
    kernel = functools.partial(actor_kernel, std_off=std_off)

    out = pl.pallas_call(
        kernel,
        out_shape=jax.ShapeDtypeStruct((b_pad, head_w), jnp.float32),
        grid_spec=pltpu.PrefetchScalarGridSpec(
            num_scalar_prefetch=0,
            grid=(grid_b,),
            in_specs=[
                pl.BlockSpec((tb, n_in), lambda i: (i, 0)),   # state tile, natural width
                pl.BlockSpec(w1.shape, const),
                pl.BlockSpec(b1.shape, const),
                pl.BlockSpec(w2.shape, const),
                pl.BlockSpec(b2.shape, const),
                pl.BlockSpec(wh.shape, const),
                pl.BlockSpec(bh.shape, const),
            ],
            out_specs=pl.BlockSpec((tb, head_w), lambda i: (i, 0)),
        ),
        compiler_params=pltpu.CompilerParams(
            dimension_semantics=("parallel",)),
    )(x, w1, b1, w2, b2, wh, bh)

    # slice away batch padding and the unused packed lanes
    mean = out[:batch, :n_actions]
    std = out[:batch, std_off:std_off + n_actions]
    return mean, std


# ----------------------------------------------------------------------------- params
def xavier_uniform(key, fan_in, fan_out, dtype=jnp.float32):
    # matches torch.nn.init.xavier_uniform_ with gain=1
    limit = jnp.sqrt(6.0 / (fan_in + fan_out))
    return jax.random.uniform(key, (fan_in, fan_out), dtype, minval=-limit, maxval=limit)


def make_params(key, n_inputs, hidden_dim, n_actions):
    """Unpadded f32 parameters, matching the PyTorch module (W stored (in, out))."""
    k1, k2, k3, k4 = jax.random.split(key, 4)
    return dict(
        w1=xavier_uniform(k1, n_inputs, hidden_dim),
        b1=jnp.zeros((1, hidden_dim), jnp.float32),
        w2=xavier_uniform(k2, hidden_dim, hidden_dim),
        b2=jnp.zeros((1, hidden_dim), jnp.float32),
        wm=xavier_uniform(k3, hidden_dim, n_actions),
        bm=jnp.zeros((1, n_actions), jnp.float32),
        ws=xavier_uniform(k4, hidden_dim, n_actions),
        bs=jnp.zeros((1, n_actions), jnp.float32),
    )


def prepare_params(p):
    """One-time prep: pad hidden to 128, keep the input dim at its natural width,
    pack the two heads into a single 128-lane weight block (mean lanes [0,n_act),
    log_std lanes [std_off, std_off+n_act)), cast MXU weights to bf16 (biases stay
    f32 for f32 accumulation / elementwise)."""
    n_in, hid = p["w1"].shape
    n_act = p["wm"].shape[1]
    h_pad = _round_up(hid, LANE)

    if 2 * n_act <= LANE:
        head_w, std_off = LANE, LANE // 2
    else:
        a_pad = _round_up(n_act, LANE)
        head_w, std_off = 2 * a_pad, a_pad

    wh = jnp.zeros((h_pad, head_w), jnp.float32)
    wh = wh.at[:hid, :n_act].set(p["wm"])
    wh = wh.at[:hid, std_off:std_off + n_act].set(p["ws"])
    bh = jnp.zeros((1, head_w), jnp.float32)
    bh = bh.at[:, :n_act].set(p["bm"][0])
    bh = bh.at[:, std_off:std_off + n_act].set(p["bs"][0])

    return dict(
        w1=_pad2(p["w1"], n_in, h_pad).astype(jnp.bfloat16),   # no input-dim padding
        b1=_pad2(p["b1"], 1, h_pad),
        w2=_pad2(p["w2"], h_pad, h_pad).astype(jnp.bfloat16),
        b2=_pad2(p["b2"], 1, h_pad),
        wh=wh.astype(jnp.bfloat16),
        bh=bh,
        std_off=std_off,                                       # python int (static)
    )


# ----------------------------------------------------------------------------- refs
def reference_forward(state, p):
    """Pure f32 reference (matches the PyTorch module numerics)."""
    h1 = jnp.maximum(state @ p["w1"] + p["b1"], 0.0)
    h2 = jnp.maximum(h1 @ p["w2"] + p["b2"], 0.0)
    mean = h2 @ p["wm"] + p["bm"]
    log_std = jnp.clip(h2 @ p["ws"] + p["bs"], LOG_STD_MIN, LOG_STD_MAX)
    return mean, jnp.exp(log_std)


def _bf16_dot(x, w):
    return jnp.dot(x.astype(jnp.bfloat16), w.astype(jnp.bfloat16),
                   preferred_element_type=jnp.float32)


def reference_forward_bf16(state, p):
    """Reference with the same bf16-operand / f32-accumulate matmuls as the kernel."""
    h1 = jnp.maximum(_bf16_dot(state, p["w1"]) + p["b1"], 0.0)
    h2 = jnp.maximum(_bf16_dot(h1, p["w2"]) + p["b2"], 0.0)
    mean = _bf16_dot(h2, p["wm"]) + p["bm"]
    log_std = jnp.clip(_bf16_dot(h2, p["ws"]) + p["bs"], LOG_STD_MIN, LOG_STD_MAX)
    return mean, jnp.exp(log_std)


# ----------------------------------------------------------------------------- main
if __name__ == "__main__":
    n_inputs, hidden_dim, n_actions = 16, 32, 4

    key = jax.random.PRNGKey(0)
    k_state, k_params, k_big, k_odd = jax.random.split(key, 4)
    p = make_params(k_params, n_inputs, hidden_dim, n_actions)
    pp = prepare_params(p)
    std_off = pp["std_off"]

    def run_and_check(state):
        mean, std = actor_forward(state, pp["w1"], pp["b1"], pp["w2"], pp["b2"],
                                  pp["wh"], pp["bh"],
                                  n_actions=n_actions, std_off=std_off)
        jax.block_until_ready((mean, std))
        assert mean.shape == (state.shape[0], n_actions)
        assert std.shape == (state.shape[0], n_actions)
        # tight check vs a reference that uses the same bf16 MXU operands
        m_ref, s_ref = reference_forward_bf16(state, p)
        assert jnp.allclose(mean, m_ref, atol=1e-3, rtol=1e-3)
        assert jnp.allclose(std, s_ref, atol=1e-3, rtol=1e-3)
        # sanity check vs the pure-f32 PyTorch-equivalent reference
        m_f32, s_f32 = reference_forward(state, p)
        assert jnp.allclose(mean, m_f32, atol=5e-2, rtol=5e-2)
        assert jnp.allclose(std, s_f32, atol=5e-2, rtol=5e-2)
        assert jnp.all(std > 0.0)

    # small shape consistent with the module: state (batch, n_inputs)
    state_small = jax.random.normal(k_state, (8, n_inputs), jnp.float32)
    run_and_check(state_small)

    # larger, non-multiple batch: pads only to 1544 (not 2048), grid of 2 equal tiles
    state_big = jax.random.normal(k_big, (1537, n_inputs), jnp.float32)
    run_and_check(state_big)

    # batch where the last grid block is partial -> exercises Pallas edge masking
    state_odd = jax.random.normal(k_odd, (1000, n_inputs), jnp.float32)
    run_and_check(state_odd)

    # TODO(synk): sample() (Normal.rsample + tanh squash + log-prob) is stochastic and
    # not part of forward(); it could be fused later with pltpu.prng_* to amortize launch cost.
    print("KERNEL_OK")
</pallas_src>

<mosaic_0001>
module attributes {stable_mosaic.version = 11 : i64} {
  func.func @actor_kernel(%arg0: i32, %arg1: memref<8x16xf32, #tpu.memory_space<vmem>>, %arg2: memref<16x128xbf16, #tpu.memory_space<vmem>>, %arg3: memref<1x128xf32, #tpu.memory_space<vmem>>, %arg4: memref<128x128xbf16, #tpu.memory_space<vmem>>, %arg5: memref<1x128xf32, #tpu.memory_space<vmem>>, %arg6: memref<128x128xbf16, #tpu.memory_space<vmem>>, %arg7: memref<1x128xf32, #tpu.memory_space<vmem>>, %arg8: memref<8x128xf32, #tpu.memory_space<vmem>>) attributes {dimension_semantics = [#tpu.dimension_semantics<parallel>], iteration_bounds = array<i64: 1>, scalar_prefetch = 0 : i64, scratch_operands = 0 : i64, tpu.core_type = #tpu.core_type<tc>, window_params = [{transform_indices = @transform_0, window_bounds = array<i64: 8, 16>}, {pipeline_mode = #tpu.pipeline_mode<synchronous>, transform_indices = @transform_1, window_bounds = array<i64: 16, 128>}, {pipeline_mode = #tpu.pipeline_mode<synchronous>, transform_indices = @transform_2, window_bounds = array<i64: 1, 128>}, {pipeline_mode = #tpu.pipeline_mode<synchronous>, transform_indices = @transform_3, window_bounds = array<i64: 128, 128>}, {pipeline_mode = #tpu.pipeline_mode<synchronous>, transform_indices = @transform_4, window_bounds = array<i64: 1, 128>}, {pipeline_mode = #tpu.pipeline_mode<synchronous>, transform_indices = @transform_5, window_bounds = array<i64: 128, 128>}, {pipeline_mode = #tpu.pipeline_mode<synchronous>, transform_indices = @transform_6, window_bounds = array<i64: 1, 128>}, {transform_indices = @transform_7, window_bounds = array<i64: 8, 128>}]} {
    %c0 = arith.constant 0 : index
    %c0_0 = arith.constant 0 : index
    %0 = vector.load %arg1[%c0, %c0_0] : memref<8x16xf32, #tpu.memory_space<vmem>>, vector<8x16xf32>
    %1 = arith.truncf %0 : vector<8x16xf32> to vector<8x16xbf16>
    %c0_1 = arith.constant 0 : index
    %c0_2 = arith.constant 0 : index
    %2 = vector.load %arg2[%c0_1, %c0_2] : memref<16x128xbf16, #tpu.memory_space<vmem>>, vector<16x128xbf16>
    %cst = arith.constant dense<0.000000e+00> : vector<8x128xf32>
    %3 = tpu.matmul %1, %2, %cst {dimension_numbers = #tpu.dot_dimension_numbers<[1], [0], [0], [1], [0, 0, 1, 1], [], []>} : vector<8x16xbf16>, vector<16x128xbf16>, vector<8x128xf32> -> vector<8x128xf32>
    %c0_3 = arith.constant 0 : index
    %c0_4 = arith.constant 0 : index
    %4 = vector.load %arg3[%c0_3, %c0_4] : memref<1x128xf32, #tpu.memory_space<vmem>>, vector<1x128xf32>
    %5 = vector.broadcast %4 : vector<1x128xf32> to vector<8x128xf32>
    %6 = arith.addf %3, %5 : vector<8x128xf32>
    %cst_5 = arith.constant 0.000000e+00 : f32
    %7 = vector.broadcast %cst_5 : f32 to vector<8x128xf32>
    %8 = arith.maximumf %6, %7 : vector<8x128xf32>
    %9 = arith.truncf %8 : vector<8x128xf32> to vector<8x128xbf16>
    %c0_6 = arith.constant 0 : index
    %c0_7 = arith.constant 0 : index
    %10 = vector.load %arg4[%c0_6, %c0_7] : memref<128x128xbf16, #tpu.memory_space<vmem>>, vector<128x128xbf16>
    %cst_8 = arith.constant dense<0.000000e+00> : vector<8x128xf32>
    %11 = tpu.matmul %9, %10, %cst_8 {dimension_numbers = #tpu.dot_dimension_numbers<[1], [0], [0], [1], [0, 0, 1, 1], [], []>} : vector<8x128xbf16>, vector<128x128xbf16>, vector<8x128xf32> -> vector<8x128xf32>
    %c0_9 = arith.constant 0 : index
    %c0_10 = arith.constant 0 : index
    %12 = vector.load %arg5[%c0_9, %c0_10] : memref<1x128xf32, #tpu.memory_space<vmem>>, vector<1x128xf32>
    %13 = vector.broadcast %12 : vector<1x128xf32> to vector<8x128xf32>
    %14 = arith.addf %11, %13 : vector<8x128xf32>
    %cst_11 = arith.constant 0.000000e+00 : f32
    %15 = vector.broadcast %cst_11 : f32 to vector<8x128xf32>
    %16 = arith.maximumf %14, %15 : vector<8x128xf32>
    %17 = arith.truncf %16 : vector<8x128xf32> to vector<8x128xbf16>
    %c0_12 = arith.constant 0 : index
    %c0_13 = arith.constant 0 : index
    %18 = vector.load %arg6[%c0_12, %c0_13] : memref<128x128xbf16, #tpu.memory_space<vmem>>, vector<128x128xbf16>
    %cst_14 = arith.constant dense<0.000000e+00> : vector<8x128xf32>
    %19 = tpu.matmul %17, %18, %cst_14 {dimension_numbers = #tpu.dot_dimension_numbers<[1], [0], [0], [1], [0, 0, 1, 1], [], []>} : vector<8x128xbf16>, vector<128x128xbf16>, vector<8x128xf32> -> vector<8x128xf32>
    %c0_15 = arith.constant 0 : index
    %c0_16 = arith.constant 0 : index
    %20 = vector.load %arg7[%c0_15, %c0_16] : memref<1x128xf32, #tpu.memory_space<vmem>>, vector<1x128xf32>
    %21 = vector.broadcast %20 : vector<1x128xf32> to vector<8x128xf32>
    %22 = arith.addf %19, %21 : vector<8x128xf32>
    %23 = tpu.iota {dimensions = array<i32: 1>} : vector<8x128xi32>
    %cst_17 = arith.constant -2.000000e+01 : f32
    %cst_18 = arith.constant 2.000000e+00 : f32
    %24 = vector.broadcast %cst_17 : f32 to vector<8x128xf32>
    %25 = arith.maximumf %24, %22 : vector<8x128xf32>
    %26 = vector.broadcast %cst_18 : f32 to vector<8x128xf32>
    %27 = arith.minimumf %26, %25 : vector<8x128xf32>
    %28 = math.exp %27 : vector<8x128xf32>
    %c64_i32 = arith.constant 64 : i32
    %29 = vector.broadcast %c64_i32 : i32 to vector<8x128xi32>
    %30 = arith.cmpi sge, %23, %29 : vector<8x128xi32>
    %31 = arith.select %30, %28, %22 : vector<8x128xi1>, vector<8x128xf32>
    %c0_19 = arith.constant 0 : index
    %c0_20 = arith.constant 0 : index
    %32 = vector.load %arg8[%c0_19, %c0_20] : memref<8x128xf32, #tpu.memory_space<vmem>>, vector<8x128xf32>
    tpu.vector_store %arg8[%c0_19, %c0_20], %31 {strides = array<i32>} : memref<8x128xf32, #tpu.memory_space<vmem>>, vector<8x128xf32>,
    return
  }
  func.func @transform_0(%arg0: i32) -> (i32, i32) {
    %c0_i32 = arith.constant 0 : i32
    %c0_i32_0 = arith.constant 0 : i32
    return %arg0, %c0_i32 : i32, i32
  }
  func.func @transform_1(%arg0: i32) -> (i32, i32) {
    %c0_i32 = arith.constant 0 : i32
    %c0_i32_0 = arith.constant 0 : i32
    %c0_i32_1 = arith.constant 0 : i32
    return %c0_i32, %c0_i32_0 : i32, i32
  }
  func.func @transform_2(%arg0: i32) -> (i32, i32) {
    %c0_i32 = arith.constant 0 : i32
    %c0_i32_0 = arith.constant 0 : i32
    %c0_i32_1 = arith.constant 0 : i32
    return %c0_i32, %c0_i32_0 : i32, i32
  }
  func.func @transform_3(%arg0: i32) -> (i32, i32) {
    %c0_i32 = arith.constant 0 : i32
    %c0_i32_0 = arith.constant 0 : i32
    %c0_i32_1 = arith.constant 0 : i32
    return %c0_i32, %c0_i32_0 : i32, i32
  }
  func.func @transform_4(%arg0: i32) -> (i32, i32) {
    %c0_i32 = arith.constant 0 : i32
    %c0_i32_0 = arith.constant 0 : i32
    %c0_i32_1 = arith.constant 0 : i32
    return %c0_i32, %c0_i32_0 : i32, i32
  }
  func.func @transform_5(%arg0: i32) -> (i32, i32) {
    %c0_i32 = arith.constant 0 : i32
    %c0_i32_0 = arith.constant 0 : i32
    %c0_i32_1 = arith.constant 0 : i32
    return %c0_i32, %c0_i32_0 : i32, i32
  }
  func.func @transform_6(%arg0: i32) -> (i32, i32) {
    %c0_i32 = arith.constant 0 : i32
    %c0_i32_0 = arith.constant 0 : i32
    %c0_i32_1 = arith.constant 0 : i32
    return %c0_i32, %c0_i32_0 : i32, i32
  }
  func.func @transform_7(%arg0: i32) -> (i32, i32) {
    %c0_i32 = arith.constant 0 : i32
    %c0_i32_0 = arith.constant 0 : i32
    return %arg0, %c0_i32 : i32, i32
  }
}

</mosaic_0001>

<bundles_post_ra>
// kernel: actor_forward.1
= control target key start
LH: loop header
LB: loop body
LE: loop exit
PB: predicated region body
PF: predicated region fallthrough
CT: control target
= control target key end

     0   :  { %12 = vsyncpa [#allocation3], 0  ;;  %s728_s0 = inlined_call_operand.hbm [shape: f32[8,16], index: 0, kind: input, shape index: {}]   ;;  %s729_s1 = inlined_call_operand.hbm [shape: bf16[16,128], index: 1, kind: input, shape index: {}]   ;;  %s730_s2 = inlined_call_operand.vmem [shape: f32[1,128], index: 2, kind: input, shape index: {}]   ;;  %s731_s3 = inlined_call_operand.hbm [shape: bf16[128,128], index: 3, kind: input, shape index: {}]   ;;  %s732_s4 = inlined_call_operand.vmem [shape: f32[1,128], index: 4, kind: input, shape index: {}]   ;;  %s733_s5 = inlined_call_operand.hbm [shape: bf16[128,128], index: 5, kind: input, shape index: {}]   ;;  %s734_s6 = inlined_call_operand.vmem [shape: f32[1,128], index: 6, kind: input, shape index: {}]   ;;  %s735_s7 = inlined_call_operand.vmem [shape: f32[8,128], index: 7, kind: output, shape index: {}]  }
   0x1   :  { %13 = vsyncpa [#allocation5], 0 }
   0x2   :  { %14 = vsyncpa [#allocation8], 0  ;;  %s591_s24 = smov [#allocation4]   ;;  %s497_s28 = scalar_lea.hbm %s729_s1, 128 }
   0x3   :  { %s30_s25 = sshll.u32 %s591_s24, 4  ;;  %p498_p0 = scmp.ne.s32.totalorder %s729_s1, %s497_s28  ;;  %s31_s25 = int_to_ptr.vmem [resolvable:$true] %s30_s25 }
   0x4   :  { %p501_p1 = scmp.lt.u32.totalorder %s497_s28, %s729_s1 }
   0x6   :  { %p503_p2 = pnand %p501_p1, %p498_p0 }
   0x8   :  { %506 = shalt.err (!%p503_p2)
}
   0x9   :  { %s507_s10 = scalar_lea.vmem %s31_s25, 128  ;;  %p512_p4 = scmp.lt.s32.totalorder %s31_s25, %s31_s25 }
   0xa   :  { %p508_p3 = scmp.ne.s32.totalorder %s31_s25, %s507_s10  ;;  %p513_p5 = scmp.lt.s32.totalorder %s507_s10, %s507_s10 }
   0xc   :  { %p514_p6 = por %p513_p5, %p512_p4 }
   0xe   :  { %p515_p7 = pnand %p514_p6, %p508_p3 }
  0x10   :  { %518 = shalt.err (!%p515_p7)
}
  0x11   :  { %s592_s11 = smov 64   ;;  %s593_s12 = smov 4  }
  0x12   :  { %36 = dma.hbm_to_vmem [thread:$0]  %s729_s1, 128, %s31_s25, [#allocation5], %s592_s11, %s592_s11, %s593_s12  }
  0x13   :  { %s594_s15 = smov [#allocation2]   ;;  %s595_s17 = smov [#allocation6]  }
  0x14   :  { %s21_s16 = sshll.u32 %s594_s15, 4  ;;  %s44_s18 = sshll.u32 %s595_s17, 4  ;;  %s22_s16 = int_to_ptr.vmem [resolvable:$true] %s21_s16  ;;  %s45_s18 = int_to_ptr.vmem [resolvable:$true] %s44_s18 }
  0x15   :  { %s519_s21 = scalar_lea.hbm %s728_s0, 128 }
  0x16   :  { %p520_p8 = scmp.ne.s32.totalorder %s728_s0, %s519_s21  ;;  %p523_p9 = scmp.lt.u32.totalorder %s519_s21, %s728_s0 }
  0x18   :  { %p525_p10 = pnand %p523_p9, %p520_p8 }
  0x1a   :  { %528 = shalt.err (!%p525_p10)
}
  0x1b   :  { %s529_s1 = scalar_lea.vmem %s22_s16, 128  ;;  %p534_p12 = scmp.lt.s32.totalorder %s22_s16, %s22_s16 }
  0x1c   :  { %p530_p11 = scmp.ne.s32.totalorder %s22_s16, %s529_s1  ;;  %p535_p13 = scmp.lt.s32.totalorder %s529_s1, %s529_s1 }
  0x1e   :  { %p536_p0 = por %p535_p13, %p534_p12 }
  0x20   :  { %p537_p1 = pnand %p536_p0, %p530_p11 }
  0x22   :  { %540 = shalt.err (!%p537_p1)
}
  0x23   :  { %24 = dma.hbm_to_vmem [thread:$0]  %s728_s0, 128, %s22_s16, [#allocation3]  }
  0x24   :  { %s541_s30 = scalar_lea.hbm %s731_s3, 1024 }
  0x25   :  { %p542_p2 = scmp.ne.s32.totalorder %s731_s3, %s541_s30  ;;  %p545_p3 = scmp.lt.u32.totalorder %s541_s30, %s731_s3 }
  0x27   :  { %p547_p4 = pnand %p545_p3, %p542_p2 }
  0x29   :  { %550 = shalt.err (!%p547_p4)
}
  0x2a   :  { %s551_s14 = scalar_lea.vmem %s45_s18, 1024  ;;  %p556_p6 = scmp.lt.s32.totalorder %s45_s18, %s45_s18 }
  0x2b   :  { %p552_p5 = scmp.ne.s32.totalorder %s45_s18, %s551_s14  ;;  %p557_p7 = scmp.lt.s32.totalorder %s551_s14, %s551_s14 }
  0x2d   :  { %p558_p8 = por %p557_p7, %p556_p6 }
  0x2f   :  { %p559_p9 = pnand %p558_p8, %p552_p5 }
  0x31   :  { %562 = shalt.err (!%p559_p9)
}
  0x32   :  { %50 = dma.hbm_to_vmem [thread:$0]  %s731_s3, 1024, %s45_s18, [#allocation5], %s592_s11, %s592_s11, %s593_s12  }
  0x33   :  { %s596_s16 = smov [#allocation7]   ;;  %s563_s21 = scalar_lea.hbm %s733_s5, 1024 }
  0x34   :  { %s58_s17 = sshll.u32 %s596_s16, 4  ;;  %p564_p10 = scmp.ne.s32.totalorder %s733_s5, %s563_s21  ;;  %s59_s17 = int_to_ptr.vmem [resolvable:$true] %s58_s17 }
  0x35   :  { %p567_p11 = scmp.lt.u32.totalorder %s563_s21, %s733_s5 }
  0x37   :  { %p569_p12 = pnand %p567_p11, %p564_p10 }
  0x39   :  { %572 = shalt.err (!%p569_p12)
}
  0x3a   :  { %s573_s1 = scalar_lea.vmem %s59_s17, 1024  ;;  %p578_p0 = scmp.lt.s32.totalorder %s59_s17, %s59_s17 }
  0x3b   :  { %p574_p13 = scmp.ne.s32.totalorder %s59_s17, %s573_s1  ;;  %p579_p1 = scmp.lt.s32.totalorder %s573_s1, %s573_s1 }
  0x3d   :  { %p580_p2 = por %p579_p1, %p578_p0 }
  0x3f   :  { %p581_p3 = pnand %p580_p2, %p574_p13 }
  0x41   :  { %584 = shalt.err (!%p581_p3)
}
  0x42   :  { %64 = dma.hbm_to_vmem [thread:$0]  %s733_s5, 1024, %s59_s17, [#allocation8], %s592_s11, %s592_s11, %s593_s12  }
  0x43   :  { %585 = dma.done.wait [#allocation3], 128  }
  0x44   :  { %586 = vsyncadd [#allocation3], 4294967168 }
  0x45   :  { %587 = dma.done.wait [#allocation5], 1152  }
  0x46   :  { %588 = vsyncadd [#allocation5], 4294966144 }
  0x47   :  { %589 = dma.done.wait [#allocation8], 1024  }
  0x48   :  { %590 = vsyncadd [#allocation8], 4294966272  ;;  %v597_v0 = vmov 0.0   ;;  %vm598_vm0 = vmmov 0   ;;  %v478_v1 = vld [vmem:[#allocation4] sm:$0xff]   ;;  %v80_v2 = vld [vmem:[#allocation2] sm:$0xff]  ;;  %v367_v45 = vlaneseq }
  0x49   :  { %424 = vmatprep.subr.bf16.mxu0 %v597_v0  ;;  %426 = vmatprep.mubr.msk.bf16.mxu0 %vm598_vm0, %v597_v0  ;;  %v81_v3 = vpack.c.bf16 %v80_v2, %v80_v2  ;;  %vm97_vm1 = vcmask 130048   ;;  %v479_v4 = vld [vmem:[#allocation6] sm:$0xff]   ;;  %v480_v5 = vld [vmem:[#allocation6 + $0x8] sm:$0xff]   ;;  %v481_v6 = vld [vmem:[#allocation6 + $0x10] sm:$0xff]  }
  0x4a   :  { %430 = vmatprep.subr.bf16.mxu1 %v597_v0  ;;  %446 = vmatprep.mubr.msk.bf16.mxu1 %vm598_vm0, %v597_v0  ;;  %v482_v7 = vld [vmem:[#allocation6 + $0x18] sm:$0xff]   ;;  %v483_v8 = vld [vmem:[#allocation6 + $0x20] sm:$0xff]   ;;  %v484_v9 = vld [vmem:[#allocation6 + $0x28] sm:$0xff]   ;;  %v368_v46 = vand.u32 127, %v367_v45 }
  0x4b   :  { %425 = vmatpush3.bf16.msra.mxu0 %v478_v1  ;;  %431 = vmatpush3.bf16.msra.mxu1 %v479_v4  ;;  %v485_v10 = vld [vmem:[#allocation6 + $0x30] sm:$0xff]   ;;  %v486_v11 = vld [vmem:[#allocation6 + $0x38] sm:$0xff]   ;;  %v487_v12 = vld [vmem:[#allocation7] sm:$0xff]  }
  0x4c   :  { %450 = vmatprep.subr.bf16.mxu0 %v597_v0  ;;  %432 = vmatprep.subr.bf16.mxu1 %v597_v0  ;;  %v488_v13 = vld [vmem:[#allocation7 + $0x8] sm:$0xff]   ;;  %v489_v14 = vld [vmem:[#allocation7 + $0x10] sm:$0xff]   ;;  %v490_v15 = vld [vmem:[#allocation7 + $0x18] sm:$0xff]   ;;  %vm373_vm2 = vcmp.ge.s32.totalorder %v368_v46, 64 }
  0x4d   :  { %v491_v16 = vld [vmem:[#allocation7 + $0x20] sm:$0xff]   ;;  %v492_v17 = vld [vmem:[#allocation7 + $0x28] sm:$0xff]   ;;  %v383_v18 = vld [vmem:[%s730_s2] ss:$0 sm:$0xff] }
  0x4e   :  { %427 = vmatmul.mubr.msk.bf16.vlgmr.msra.gmra.mrb[0].mxu0 %vm97_vm1, %v81_v3  ;;  %v493_v26 = vld [vmem:[#allocation7 + $0x30] sm:$0xff]   ;;  %v494_v27 = vld [vmem:[#allocation7 + $0x38] sm:$0xff]  }
  0x4f   :  { %466 = vmatprep.mubr.msk.bf16.mxu0 %vm598_vm0, %v597_v0  ;;  %433 = vmatpush3.bf16.msra.mxu1 %v480_v5  ;;  %v386_v28 = vld [vmem:[%s732_s4] ss:$0 sm:$0xff] }
  0x50   :  { %434 = vmatprep.subr.bf16.mxu1 %v597_v0  ;;  %451 = vmatpush3.bf16.msra.mxu0 %v487_v12  ;;  %v395_v36 = vld [vmem:[%s734_s6] ss:$0 sm:$0xff] }
  0x51   :  { %452 = vmatprep.subr.bf16.mxu0 %v597_v0 }
  0x53   :  { %435 = vmatpush3.bf16.msra.mxu1 %v481_v6 }
  0x54   :  { %436 = vmatprep.subr.bf16.mxu1 %v597_v0  ;;  %453 = vmatpush3.bf16.msra.mxu0 %v488_v13 }
  0x55   :  { %454 = vmatprep.subr.bf16.mxu0 %v597_v0 }
  0x57   :  { %437 = vmatpush3.bf16.msra.mxu1 %v482_v7 }
  0x58   :  { %438 = vmatprep.subr.bf16.mxu1 %v597_v0  ;;  %455 = vmatpush3.bf16.msra.mxu0 %v489_v14 }
  0x59   :  { %456 = vmatprep.subr.bf16.mxu0 %v597_v0 }
  0x5b   :  { %439 = vmatpush3.bf16.msra.mxu1 %v483_v8 }
  0x5c   :  { %440 = vmatprep.subr.bf16.mxu1 %v597_v0  ;;  %457 = vmatpush3.bf16.msra.mxu0 %v490_v15 }
  0x5d   :  { %458 = vmatprep.subr.bf16.mxu0 %v597_v0 }
  0x5f   :  { %441 = vmatpush3.bf16.msra.mxu1 %v484_v9 }
  0x60   :  { %442 = vmatprep.subr.bf16.mxu1 %v597_v0  ;;  %459 = vmatpush3.bf16.msra.mxu0 %v491_v16 }
  0x61   :  { %460 = vmatprep.subr.bf16.mxu0 %v597_v0 }
  0x63   :  { %443 = vmatpush3.bf16.msra.mxu1 %v485_v10 }
  0x64   :  { %444 = vmatprep.subr.bf16.mxu1 %v597_v0  ;;  %461 = vmatpush3.bf16.msra.mxu0 %v492_v17 }
  0x65   :  { %462 = vmatprep.subr.bf16.mxu0 %v597_v0 }
  0x67   :  { %445 = vmatpush3.bf16.msra.mxu1 %v486_v11 }
  0x68   :  { %463 = vmatpush3.bf16.msra.mxu0 %v493_v26 }
  0x69   :  { %464 = vmatprep.subr.bf16.mxu0 %v597_v0 }
  0x6c   :  { %465 = vmatpush3.bf16.msra.mxu0 %v494_v27 }
 0x121   :  { %v135_v19 = vpop.f32.mrb[0].mxu0 }
 0x122   :  { %v136_v20 = vadd.f32 %v383_v18, %v135_v19  ;;  %v428_v21 = vpop.f32.mrb[1].mxu0 }
 0x123   :  { %v138_v22 = vpop.f32.mrb[2].mxu0 }
 0x124   :  { %v141_v23 = vmax.f32 %v136_v20, 0.0  ;;  %v429_v24 = vpop.f32.mrb[3].mxu0 }
 0x126   :  { %v142_v25 = vpack.c.bf16 %v141_v23, %v141_v23 }
 0x128   :  { %447 = vmatmul.mubr.bf16.vlgmr.msra.gmra.mrb[0].mxu1 %v142_v25 }
 0x1fb   :  { %v248_v29 = vpop.f32.mrb[0].mxu1 }
 0x1fc   :  { %v249_v30 = vadd.f32 %v386_v28, %v248_v29  ;;  %v448_v31 = vpop.f32.mrb[1].mxu1 }
 0x1fd   :  { %v251_v32 = vpop.f32.mrb[2].mxu1 }
 0x1fe   :  { %v254_v33 = vmax.f32 %v249_v30, 0.0  ;;  %v449_v34 = vpop.f32.mrb[3].mxu1 }
 0x200   :  { %v255_v35 = vpack.c.bf16 %v254_v33, %v254_v33 }
 0x202   :  { %467 = vmatmul.mubr.bf16.vlgmr.msra.gmra.mrb[4].mxu0 %v255_v35 }
 0x2d5   :  { %v361_v37 = vpop.f32.mrb[4].mxu0 }
 0x2d6   :  { %v362_v38 = vadd.f32 %v395_v36, %v361_v37  ;;  %v468_v39 = vpop.f32.mrb[5].mxu0 }
 0x2d7   :  { %v364_v40 = vpop.f32.mrb[6].mxu0 }
 0x2d8   :  { %v369_v41 = vmax.f32 %v362_v38, -20.0  ;;  %v469_v42 = vpop.f32.mrb[7].mxu0 }
 0x2da   :  { %v370_v43 = vmin.f32 %v369_v41, 2.0 }
 0x2dc   :  { %v371_v44 = vmul.f32 1.442695, %v370_v43 }
 0x2de   :  { %495 = vpow2.f32 %v371_v44 }
 0x2e8   :  { %v496_v47 = vpop.eup %495 }
 0x2e9   :  { %v374_v48 = vsel %vm373_vm2, %v496_v47, %v362_v38 }
 0x2ea   :  { %375 = vst [vmem:[%s735_s7] sm:$0xff] %v374_v48 }
 0x2eb   :  { %380 = vsyncpa [#allocation3], 1 }
 0x2ec   :  { %381 = vsyncpa [#allocation5], 1 }
 0x2ed   :  { %382 = vsyncpa [#allocation8], 1 }

</bundles_post_ra>
